<compile_context>
chip_gen: v6e
topology: v6e:2x2x1
jax: 0.10.0
libtpu: 0.0.40
codegen_flags: <defaults>
</compile_context>

<pallas_src>
import jax
import jax.numpy as jnp
from jax import lax
from jax.experimental import pallas as pl
from jax.experimental.pallas import tpu as pltpu


_VMEM_LIMIT_BYTES = 32 * 1024 * 1024  # safe on v5e/v6e (128 MiB) and v7x (64 MiB)


# --------------------------------------------------------------------------
# Pass 1: per-bond half energies, bond-only grid.
# --------------------------------------------------------------------------
def _make_ebond_kernel(slab):
    """slab: static chunk size (multiple of 128) of the atom axis; divides N_pad."""

    def kernel(xyz_t_ref, adj_t_ref, blen_t_ref, bpar_t_ref, ebond_ref):
        n_pad = xyz_t_ref.shape[1]
        tb = adj_t_ref.shape[1]
        n_slabs = n_pad // slab  # static

        adj = adj_t_ref[...]                 # [2, tb] i32
        i0 = adj[0:1, :]                     # [1, tb]
        i1 = adj[1:2, :]                     # [1, tb]

        def slab_diff(start):
            # d_T[c, b] = xyz[i0_b, c] - xyz[i1_b, c], restricted to atoms in
            # [start, start+slab); summed over slabs this is the full gather.
            xyz_slab = xyz_t_ref[:, pl.ds(start, slab)]                  # [8, slab]
            iota = lax.broadcasted_iota(jnp.int32, (slab, tb), 0) + start
            oh = ((iota == i0).astype(jnp.float32)
                  - (iota == i1).astype(jnp.float32))                    # [slab, tb]
            return jnp.dot(xyz_slab, oh,
                           preferred_element_type=jnp.float32,
                           precision=lax.Precision.HIGHEST)              # [8, tb]

        if n_slabs == 1:
            d = slab_diff(0)
        else:
            def body(s, acc):
                start = pl.multiple_of(s * slab, 128)
                return acc + slab_diff(start)
            d = lax.fori_loop(0, n_slabs, body,
                              jnp.zeros((8, tb), jnp.float32))

        # ||d||^2 as three explicit row mul-adds (lane-dense, no XLU reduce).
        e = jnp.sqrt(d[0:1, :] * d[0:1, :]
                     + d[1:2, :] * d[1:2, :]
                     + d[2:3, :] * d[2:3, :])                            # [1, tb]

        # Half energy per endpoint; padded bond slots have bpar == 0 -> zero.
        ebond_ref[...] = (0.5 * bpar_t_ref[...]) * (e - blen_t_ref[...]) ** 2

    return kernel


# --------------------------------------------------------------------------
# Pass 2: scatter_add onto atom tiles via MXU matmul, accumulator over bonds.
# --------------------------------------------------------------------------
def _scatter_kernel(ebond_ref, adj_rows_ref, out_ref):
    # Grid: axis 0 = atom tiles ("parallel"), axis 1 = bond tiles ("arbitrary").
    j = pl.program_id(1)

    @pl.when(j == 0)
    def _init():
        out_ref[...] = jnp.zeros_like(out_ref)

    tb = adj_rows_ref.shape[0]
    tn = out_ref.shape[1]

    adj_rows = adj_rows_ref[...]                                  # [tb, 2] i32
    i0 = adj_rows[:, 0:1]                                         # [tb, 1]
    i1 = adj_rows[:, 1:2]                                         # [tb, 1]

    atom_start = pl.program_id(0) * tn
    tile_iota = lax.broadcasted_iota(jnp.int32, (tb, tn), 1) + atom_start
    # Sum (not OR): a degenerate i0 == i1 bond deposits its full energy, which
    # matches the two scatter_adds in the reference module.
    oh_sum = ((tile_iota == i0).astype(jnp.float32)
              + (tile_iota == i1).astype(jnp.float32))            # [tb, tn]

    # energy_row[n] += sum_b (ebond_b / 2) * ((n == i0_b) + (n == i1_b))
    out_ref[...] += jnp.dot(ebond_ref[...], oh_sum,
                            preferred_element_type=jnp.float32,
                            precision=lax.Precision.HIGHEST)      # [1, tn]


# --------------------------------------------------------------------------
# Wrapper
# --------------------------------------------------------------------------
def _round_up(x, m):
    return ((x + m - 1) // m) * m


def _choose_tiles(n_atoms, n_bonds):
    # Atom tiling: collapse to a single atom tile for small/medium systems.
    if n_atoms <= 1024:
        n_pad = _round_up(max(n_atoms, 1), 128)
        tn = n_pad
    else:
        tn = 1024
        n_pad = _round_up(n_atoms, tn)

    # Slab size for the pass-1 gather contraction (bounds [slab, tb] one-hot).
    if n_pad <= 2048:
        slab = n_pad
    else:
        slab = 2048
        n_pad = _round_up(n_pad, slab)   # stays a multiple of tn (=1024)

    # Bond tiling: bigger tiles amortize the ~0.35 us/step overhead and raise
    # the K-dim of the scatter matmul.
    if n_bonds <= 512:
        b_pad = _round_up(max(n_bonds, 1), 128)
        tb = b_pad
    else:
        tb = 512
        b_pad = _round_up(n_bonds, tb)

    return n_pad, tn, slab, b_pad, tb


def bond_energy(xyz, bond_adj, bond_len, bond_par):
    """Pallas equivalent of BondEnergyModule.forward. Returns [N, 1] f32."""
    xyz = jnp.asarray(xyz, jnp.float32)
    bond_adj = jnp.asarray(bond_adj, jnp.int32)
    bond_len = jnp.asarray(bond_len, jnp.float32).reshape(-1)
    bond_par = jnp.asarray(bond_par, jnp.float32).reshape(-1)

    n_atoms = xyz.shape[0]
    n_bonds = bond_adj.shape[0]
    n_pad, tn, slab, b_pad, tb = _choose_tiles(n_atoms, n_bonds)

    # xyz transposed & sublane-padded: [8, N_pad]; rows 0..2 hold x/y/z.
    xyz_t = jnp.zeros((8, n_pad), jnp.float32).at[0:3, 0:n_atoms].set(xyz.T)

    # Bond endpoints in both orientations (tiny; avoids in-kernel transposes).
    # Padded bonds point at atom 0 but have bpar == 0 -> contribute nothing.
    adj_t = jnp.zeros((2, b_pad), jnp.int32).at[:, 0:n_bonds].set(bond_adj.T)
    adj_rows = jnp.zeros((b_pad, 2), jnp.int32).at[0:n_bonds, :].set(bond_adj)

    blen_t = jnp.zeros((1, b_pad), jnp.float32).at[0, 0:n_bonds].set(bond_len)
    bpar_t = jnp.zeros((1, b_pad), jnp.float32).at[0, 0:n_bonds].set(bond_par)

    # ---- Pass 1: per-bond half energies over a bond-only grid -------------
    ebond_t = pl.pallas_call(
        _make_ebond_kernel(slab),
        out_shape=jax.ShapeDtypeStruct((1, b_pad), jnp.float32),
        grid=(b_pad // tb,),
        in_specs=[
            pl.BlockSpec((8, n_pad), lambda j: (0, 0)),   # full xyz_t, constant idx
            pl.BlockSpec((2, tb), lambda j: (0, j)),      # adj_t bond tile
            pl.BlockSpec((1, tb), lambda j: (0, j)),      # blen_t bond tile
            pl.BlockSpec((1, tb), lambda j: (0, j)),      # bpar_t bond tile
        ],
        out_specs=pl.BlockSpec((1, tb), lambda j: (0, j)),
        compiler_params=pltpu.CompilerParams(
            dimension_semantics=("parallel",),
            vmem_limit_bytes=_VMEM_LIMIT_BYTES),
    )(xyz_t, adj_t, blen_t, bpar_t)

    # ---- Pass 2: matmul scatter onto atom tiles ----------------------------
    # TODO(synk): on v7x with a single atom tile, split the bond axis across
    # the two TensorCores into two partial energy rows and sum in the wrapper.
    out = pl.pallas_call(
        _scatter_kernel,
        out_shape=jax.ShapeDtypeStruct((1, n_pad), jnp.float32),
        grid=(n_pad // tn, b_pad // tb),
        in_specs=[
            pl.BlockSpec((1, tb), lambda i, j: (0, j)),   # ebond bond tile
            pl.BlockSpec((tb, 2), lambda i, j: (j, 0)),   # adj_rows bond tile
        ],
        # Same atom-tile block across the bond axis -> resident accumulator.
        out_specs=pl.BlockSpec((1, tn), lambda i, j: (0, i)),
        compiler_params=pltpu.CompilerParams(
            dimension_semantics=("parallel", "arbitrary"),
            vmem_limit_bytes=_VMEM_LIMIT_BYTES),
    )(ebond_t, adj_rows)

    return out[0, 0:n_atoms].reshape(n_atoms, 1)


# --------------------------------------------------------------------------
# Pure-JAX reference (matches the PyTorch forward)
# --------------------------------------------------------------------------
def _reference(xyz, bond_adj, bond_len, bond_par):
    n_atoms = xyz.shape[0]
    diff = xyz[bond_adj[:, 0]] - xyz[bond_adj[:, 1]]
    e = jnp.sqrt(jnp.sum(diff ** 2, axis=1))[:, None]
    ebond = bond_par * (e - bond_len) ** 2
    zeros = jnp.zeros((n_atoms, 1), dtype=jnp.float32)
    energy = 0.5 * zeros.at[bond_adj[:, 0]].add(ebond)
    energy = energy + 0.5 * zeros.at[bond_adj[:, 1]].add(ebond)
    return energy


if __name__ == "__main__":
    key = jax.random.PRNGKey(0)
    k_xyz, k_len, k_par = jax.random.split(key, 3)

    N_ATOMS = 16
    N_BONDS = 24

    xyz = jax.random.normal(k_xyz, (N_ATOMS, 3), dtype=jnp.float32) * 2.0

    # Deterministic bond connectivity with i != j for every bond.
    b = jnp.arange(N_BONDS, dtype=jnp.int32)
    bond_adj = jnp.stack([b % N_ATOMS, (5 * b + 1) % N_ATOMS], axis=1)  # [B, 2]

    bond_len = jax.random.uniform(
        k_len, (N_BONDS, 1), minval=0.5, maxval=1.5, dtype=jnp.float32)
    bond_par = jax.random.uniform(
        k_par, (N_BONDS, 1), minval=0.5, maxval=2.0, dtype=jnp.float32)

    energy = bond_energy(xyz, bond_adj, bond_len, bond_par)
    energy = jax.block_until_ready(energy)

    ref = _reference(xyz, bond_adj, bond_len, bond_par)
    assert energy.shape == (N_ATOMS, 1)
    assert jnp.allclose(energy, ref, atol=1e-4, rtol=1e-4), (
        f"mismatch: max abs err {jnp.max(jnp.abs(energy - ref))}")

    print("KERNEL_OK")
</pallas_src>

<mosaic_0001>
module attributes {stable_mosaic.version = 11 : i64} {
  func.func @kernel(%arg0: i32, %arg1: memref<8x128xf32, #tpu.memory_space<vmem>>, %arg2: memref<2x128xi32, #tpu.memory_space<vmem>>, %arg3: memref<1x128xf32, #tpu.memory_space<vmem>>, %arg4: memref<1x128xf32, #tpu.memory_space<vmem>>, %arg5: memref<1x128xf32, #tpu.memory_space<vmem>>) attributes {dimension_semantics = [#tpu.dimension_semantics<parallel>], iteration_bounds = array<i64: 1>, scalar_prefetch = 0 : i64, scratch_operands = 0 : i64, tpu.core_type = #tpu.core_type<tc>, window_params = [{pipeline_mode = #tpu.pipeline_mode<synchronous>, transform_indices = @transform_0, window_bounds = array<i64: 8, 128>}, {transform_indices = @transform_1, window_bounds = array<i64: 2, 128>}, {transform_indices = @transform_2, window_bounds = array<i64: 1, 128>}, {transform_indices = @transform_3, window_bounds = array<i64: 1, 128>}, {transform_indices = @transform_4, window_bounds = array<i64: 1, 128>}]} {
    %c0 = arith.constant 0 : index
    %c0_0 = arith.constant 0 : index
    %0 = vector.load %arg2[%c0, %c0_0] : memref<2x128xi32, #tpu.memory_space<vmem>>, vector<2x128xi32>
    %1 = vector.extract_strided_slice %0 {offsets = [0, 0], sizes = [1, 128], strides = [1, 1]} : vector<2x128xi32> to vector<1x128xi32>
    %2 = vector.extract_strided_slice %0 {offsets = [1, 0], sizes = [1, 128], strides = [1, 1]} : vector<2x128xi32> to vector<1x128xi32>
    %c0_1 = arith.constant 0 : index
    %c0_2 = arith.constant 0 : index
    %3 = vector.load %arg1[%c0_1, %c0_2] : memref<8x128xf32, #tpu.memory_space<vmem>>, vector<8x128xf32>
    %4 = tpu.iota {dimensions = array<i32: 0>} : vector<128x128xi32>
    %c0_i32 = arith.constant 0 : i32
    %5 = vector.broadcast %c0_i32 : i32 to vector<128x128xi32>
    %6 = arith.addi %4, %5 : vector<128x128xi32>
    %7 = vector.broadcast %1 : vector<1x128xi32> to vector<128x128xi32>
    %8 = arith.cmpi eq, %6, %7 : vector<128x128xi32>
    %9 = arith.extui %8 : vector<128x128xi1> to vector<128x128xi32>
    %10 = arith.sitofp %9 : vector<128x128xi32> to vector<128x128xf32>
    %11 = vector.broadcast %2 : vector<1x128xi32> to vector<128x128xi32>
    %12 = arith.cmpi eq, %6, %11 : vector<128x128xi32>
    %13 = arith.extui %12 : vector<128x128xi1> to vector<128x128xi32>
    %14 = arith.sitofp %13 : vector<128x128xi32> to vector<128x128xf32>
    %15 = arith.subf %10, %14 : vector<128x128xf32>
    %cst = arith.constant dense<0.000000e+00> : vector<8x128xf32>
    %16 = tpu.matmul %3, %15, %cst {dimension_numbers = #tpu.dot_dimension_numbers<[1], [0], [0], [1], [0, 0, 1, 1], [], []>, precision = #tpu.contract_precision<fp32>} : vector<8x128xf32>, vector<128x128xf32>, vector<8x128xf32> -> vector<8x128xf32>
    %17 = vector.extract_strided_slice %16 {offsets = [0, 0], sizes = [1, 128], strides = [1, 1]} : vector<8x128xf32> to vector<1x128xf32>
    %18 = vector.extract_strided_slice %16 {offsets = [0, 0], sizes = [1, 128], strides = [1, 1]} : vector<8x128xf32> to vector<1x128xf32>
    %19 = arith.mulf %17, %18 : vector<1x128xf32>
    %20 = vector.extract_strided_slice %16 {offsets = [1, 0], sizes = [1, 128], strides = [1, 1]} : vector<8x128xf32> to vector<1x128xf32>
    %21 = vector.extract_strided_slice %16 {offsets = [1, 0], sizes = [1, 128], strides = [1, 1]} : vector<8x128xf32> to vector<1x128xf32>
    %22 = arith.mulf %20, %21 : vector<1x128xf32>
    %23 = arith.addf %19, %22 : vector<1x128xf32>
    %24 = vector.extract_strided_slice %16 {offsets = [2, 0], sizes = [1, 128], strides = [1, 1]} : vector<8x128xf32> to vector<1x128xf32>
    %25 = vector.extract_strided_slice %16 {offsets = [2, 0], sizes = [1, 128], strides = [1, 1]} : vector<8x128xf32> to vector<1x128xf32>
    %26 = arith.mulf %24, %25 : vector<1x128xf32>
    %27 = arith.addf %23, %26 : vector<1x128xf32>
    %28 = math.sqrt %27 : vector<1x128xf32>
    %c0_3 = arith.constant 0 : index
    %c0_4 = arith.constant 0 : index
    %29 = vector.load %arg4[%c0_3, %c0_4] : memref<1x128xf32, #tpu.memory_space<vmem>>, vector<1x128xf32>
    %cst_5 = arith.constant 5.000000e-01 : f32
    %30 = vector.broadcast %cst_5 : f32 to vector<1x128xf32>
    %31 = arith.mulf %30, %29 : vector<1x128xf32>
    %c0_6 = arith.constant 0 : index
    %c0_7 = arith.constant 0 : index
    %32 = vector.load %arg3[%c0_6, %c0_7] : memref<1x128xf32, #tpu.memory_space<vmem>>, vector<1x128xf32>
    %33 = arith.subf %28, %32 : vector<1x128xf32>
    %34 = arith.mulf %33, %33 : vector<1x128xf32>
    %35 = arith.mulf %31, %34 : vector<1x128xf32>
    %c0_8 = arith.constant 0 : index
    %c0_9 = arith.constant 0 : index
    %36 = vector.load %arg5[%c0_8, %c0_9] : memref<1x128xf32, #tpu.memory_space<vmem>>, vector<1x128xf32>
    tpu.vector_store %arg5[%c0_8, %c0_9], %35 {strides = array<i32>} : memref<1x128xf32, #tpu.memory_space<vmem>>, vector<1x128xf32>,
    return
  }
  func.func @transform_0(%arg0: i32) -> (i32, i32) {
    %c0_i32 = arith.constant 0 : i32
    %c0_i32_0 = arith.constant 0 : i32
    %c0_i32_1 = arith.constant 0 : i32
    return %c0_i32, %c0_i32_0 : i32, i32
  }
  func.func @transform_1(%arg0: i32) -> (i32, i32) {
    %c0_i32 = arith.constant 0 : i32
    %c0_i32_0 = arith.constant 0 : i32
    return %c0_i32, %arg0 : i32, i32
  }
  func.func @transform_2(%arg0: i32) -> (i32, i32) {
    %c0_i32 = arith.constant 0 : i32
    %c0_i32_0 = arith.constant 0 : i32
    return %c0_i32, %arg0 : i32, i32
  }
  func.func @transform_3(%arg0: i32) -> (i32, i32) {
    %c0_i32 = arith.constant 0 : i32
    %c0_i32_0 = arith.constant 0 : i32
    return %c0_i32, %arg0 : i32, i32
  }
  func.func @transform_4(%arg0: i32) -> (i32, i32) {
    %c0_i32 = arith.constant 0 : i32
    %c0_i32_0 = arith.constant 0 : i32
    return %c0_i32, %arg0 : i32, i32
  }
}

</mosaic_0001>

<bundles_post_ra>
// kernel: tpu_custom_call.1
= control target key start
LH: loop header
LB: loop body
LE: loop exit
PB: predicated region body
PF: predicated region fallthrough
CT: control target
= control target key end

     0   :  { %9 = vsyncpa [#allocation3], 0  ;;  %s1814_s0 = inlined_call_operand.hbm [shape: f32[8,128], index: 0, kind: input, shape index: {}]   ;;  %s1815_s1 = inlined_call_operand.hbm [shape: s32[2,128], index: 1, kind: input, shape index: {}]   ;;  %s1816_s2 = inlined_call_operand.vmem [shape: f32[1,128], index: 2, kind: input, shape index: {}]   ;;  %s1817_s3 = inlined_call_operand.vmem [shape: f32[1,128], index: 3, kind: input, shape index: {}]   ;;  %s1818_s4 = inlined_call_operand.hbm [shape: f32[1,128], index: 4, kind: output, shape index: {}]  }
   0x1   :  { %10 = vsyncpa [#allocation6], 0 }
   0x2   :  { %11 = vsyncpa [#allocation4], 0  ;;  %s1277_s15 = smov [#allocation2]   ;;  %s1278_s17 = smov [#allocation5]  }
   0x3   :  { %s18_s16 = sshll.u32 %s1277_s15, 4  ;;  %s28_s18 = sshll.u32 %s1278_s17, 4  ;;  %s19_s16 = int_to_ptr.vmem [resolvable:$true] %s18_s16  ;;  %s29_s18 = int_to_ptr.vmem [resolvable:$true] %s28_s18 }
   0x4   :  { %s1219_s19 = scalar_lea.vmem %s19_s16, 128  ;;  %p1224_p1 = scmp.lt.s32.totalorder %s19_s16, %s19_s16 }
   0x5   :  { %p1220_p0 = scmp.ne.s32.totalorder %s19_s16, %s1219_s19  ;;  %p1225_p2 = scmp.lt.s32.totalorder %s1219_s19, %s1219_s19 }
   0x7   :  { %p1226_p3 = por %p1225_p2, %p1224_p1 }
   0x9   :  { %p1227_p4 = pnand %p1226_p3, %p1220_p0 }
   0xb   :  { %1230 = shalt.err (!%p1227_p4)
}
   0xc   :  { %21 = dma.hbm_to_vmem [thread:$0]  %s1814_s0, 128, %s19_s16, [#allocation3]  }
   0xd   :  { %s1239_s22 = scalar_lea.vmem %s29_s18, 32  ;;  %p1244_p6 = scmp.lt.s32.totalorder %s29_s18, %s29_s18 }
   0xe   :  { %p1240_p5 = scmp.ne.s32.totalorder %s29_s18, %s1239_s22  ;;  %p1245_p7 = scmp.lt.s32.totalorder %s1239_s22, %s1239_s22 }
  0x10   :  { %p1246_p8 = por %p1245_p7, %p1244_p6 }
  0x12   :  { %p1247_p9 = pnand %p1246_p8, %p1240_p5 }
  0x14   :  { %1250 = shalt.err (!%p1247_p9)
}
  0x15   :  { %31 = dma.hbm_to_vmem [thread:$0]  %s1815_s1, 32, %s29_s18, [#allocation6]  }
  0x16   :  { %1271 = dma.done.wait [#allocation3], 128  }
  0x17   :  { %1272 = vsyncadd [#allocation3], 4294967168 }
  0x18   :  { %1273 = dma.done.wait [#allocation6], 32  }
  0x19   :  { %1274 = vsyncadd [#allocation6], 4294967264  ;;  %v44_v0 = vlaneseq  ;;  %v1279_v1 = vmov 0.0   ;;  %vm1280_vm0 = vmmov 0   ;;  %v42_v10 = vld [vmem:[#allocation5] sm:$0x3] }
  0x1a   :  { %994 = vmatprep.subr.mxu0 %v1279_v1  ;;  %1029 = vmatprep.subr.mxu1 %v1279_v1  ;;  %s1281_s27 = smov [#allocation7]  }
  0x1b   :  { %v1315_v2 = vshrl.u32 %v44_v0, 7  ;;  %1026 = vmatprep.mubr.msk.f32.mxu0 %vm1280_vm0, %v1279_v1  ;;  %1061 = vmatprep.mubr.msk.f32.mxu1 %vm1280_vm0, %v1279_v1  ;;  %s850_s28 = sshll.u32 %s1281_s27, 4  ;;  %s851_s28 = int_to_ptr.vmem [resolvable:$true] %s850_s28 }
  0x1c   :  { %s1251_s29 = scalar_lea.vmem %s851_s28, 16  ;;  %s1255_s30 = scalar_lea.vmem %s851_s28, 32 }
  0x1d   :  { %v63_v3 = vsub.s32 0, %v1315_v2  ;;  %v115_v4 = vsub.s32 1, %v1315_v2  ;;  %v60_v5 = vadd.s32 120, %v1315_v2  ;;  %v59_v6 = vadd.s32 112, %v1315_v2  ;;  %p1252_p10 = scmp.ne.s32.totalorder %s851_s28, %s1251_s29  ;;  %p1256_p11 = scmp.lt.s32.totalorder %s851_s28, %s851_s28 }
  0x1e   :  { %v58_v7 = vadd.s32 104, %v1315_v2  ;;  %v57_v8 = vadd.s32 96, %v1315_v2  ;;  %v56_v9 = vadd.s32 88, %v1315_v2  ;;  %v55_v11 = vadd.s32 80, %v1315_v2  ;;  %p1257_p12 = scmp.lt.s32.totalorder %s1255_s30, %s1251_s29 }
  0x1f   :  { %v1330_v12 = vadd.s32 72, %v1315_v2  ;;  %v1333_v13 = vadd.s32 64, %v1315_v2  ;;  %v1336_v14 = vadd.s32 56, %v1315_v2  ;;  %v1338_v15 = vrot.slane %v42_v10, %v63_v3 }
  0x20   :  { %v1340_v16 = vrot.slane %v42_v10, %v115_v4  ;;  %v1343_v17 = vadd.s32 48, %v1315_v2  ;;  %v1346_v18 = vadd.s32 40, %v1315_v2  ;;  %v1349_v19 = vadd.s32 32, %v1315_v2  ;;  %p1258_p13 = por %p1257_p12, %p1256_p11 }
  0x21   :  { %v1352_v20 = vadd.s32 24, %v1315_v2  ;;  %v1355_v21 = vadd.s32 16, %v1315_v2  ;;  %v1358_v22 = vadd.s32 8, %v1315_v2  ;;  %vm80_vm1 = vcmp.eq.s32.totalorder %v60_v5, %v1338_v15 }
  0x22   :  { %vm132_vm2 = vcmp.eq.s32.totalorder %v60_v5, %v1340_v16  ;;  %vm79_vm3 = vcmp.eq.s32.totalorder %v59_v6, %v1338_v15  ;;  %vm131_vm4 = vcmp.eq.s32.totalorder %v59_v6, %v1340_v16  ;;  %v875_v23 = vsel %vm80_vm1, 1.0, %v1279_v1  ;;  %p1259_p0 = pnand %p1258_p13, %p1252_p10 }
  0x23   :  { %v891_v24 = vsel %vm132_vm2, 1.0, %v1279_v1  ;;  %v874_v25 = vsel %vm79_vm3, 1.0, %v1279_v1  ;;  %v890_v26 = vsel %vm131_vm4, 1.0, %v1279_v1  ;;  %vm78_vm5 = vcmp.eq.s32.totalorder %v58_v7, %v1338_v15 }
  0x24   :  { %v180_v27 = vsub.f32 %v875_v23, %v891_v24  ;;  %v179_v28 = vsub.f32 %v874_v25, %v890_v26  ;;  %vm130_vm6 = vcmp.eq.s32.totalorder %v58_v7, %v1340_v16  ;;  %v873_v29 = vsel %vm78_vm5, 1.0, %v1279_v1  ;;  %v1453_v7 = vld [vmem:[#allocation2] sm:$0xff] }
  0x25   :  { %v889_v30 = vsel %vm130_vm6, 1.0, %v1279_v1  ;;  %vm77_vm7 = vcmp.eq.s32.totalorder %v57_v8, %v1338_v15  ;;  %vm129_vm8 = vcmp.eq.s32.totalorder %v57_v8, %v1340_v16  ;;  %vm76_vm9 = vcmp.eq.s32.totalorder %v56_v9, %v1338_v15 }
  0x26   :  { %v1374_v31 = vand.u32 4294901760, %v180_v27  ;;  %v1376_v32 = vand.u32 4294901760, %v179_v28  ;;  %v178_v33 = vsub.f32 %v873_v29, %v889_v30  ;;  %v872_v34 = vsel %vm77_vm7, 1.0, %v1279_v1 }
  0x27   :  { %v888_v35 = vsel %vm129_vm8, 1.0, %v1279_v1  ;;  %vm128_vm10 = vcmp.eq.s32.totalorder %v56_v9, %v1340_v16  ;;  %vm75_vm11 = vcmp.eq.s32.totalorder %v55_v11, %v1338_v15  ;;  %v871_v38 = vsel %vm76_vm9, 1.0, %v1279_v1 }
  0x28   :  { %995 = vmatpush3.msra.mxu0 %v1374_v31  ;;  %v1384_v36 = vand.u32 4294901760, %v178_v33  ;;  %v177_v37 = vsub.f32 %v872_v34, %v888_v35  ;;  %v887_v39 = vsel %vm128_vm10, 1.0, %v1279_v1  ;;  %v1390_v41 = vsub.f32 %v180_v27, %v1374_v31 }
  0x29   :  { %996 = vmatprep.subr.mxu0 %v1279_v1  ;;  %v176_v40 = vsub.f32 %v871_v38, %v887_v39  ;;  %v870_v42 = vsel %vm75_vm11, 1.0, %v1279_v1  ;;  %vm127_vm12 = vcmp.eq.s32.totalorder %v55_v11, %v1340_v16  ;;  %v1399_v45 = vsub.f32 %v179_v28, %v1376_v32 }
  0x2a   :  { %997 = vmatpush3.msra.mxu0 %v1376_v32  ;;  %v1395_v43 = vand.u32 4294901760, %v177_v37  ;;  %v886_v44 = vsel %vm127_vm12, 1.0, %v1279_v1  ;;  %vm74_vm13 = vcmp.eq.s32.totalorder %v1330_v12, %v1338_v15  ;;  %v275_v47 = vand.u32 4294901760, %v1390_v41 }
  0x2b   :  { %998 = vmatprep.subr.mxu0 %v1279_v1  ;;  %v1404_v46 = vand.u32 4294901760, %v176_v40  ;;  %v175_v48 = vsub.f32 %v870_v42, %v886_v44  ;;  %v869_v49 = vsel %vm74_vm13, 1.0, %v1279_v1  ;;  %v282_v50 = vand.u32 4294901760, %v1399_v45 }
  0x2c   :  { %999 = vmatpush3.msra.mxu0 %v1384_v36  ;;  %vm126_vm14 = vcmp.eq.s32.totalorder %v1330_v12, %v1340_v16  ;;  %v1413_v51 = vsub.f32 %v178_v33, %v1384_v36  ;;  %vm73_vm15 = vcmp.eq.s32.totalorder %v1333_v13, %v1338_v15  ;;  %v276_v52 = vsub.f32 %v1390_v41, %v275_v47 }
  0x2d   :  { %1000 = vmatprep.subr.mxu0 %v1279_v1  ;;  %v1421_v53 = vand.u32 4294901760, %v175_v48  ;;  %v885_v54 = vsel %vm126_vm14, 1.0, %v1279_v1  ;;  %v868_v55 = vsel %vm73_vm15, 1.0, %v1279_v1  ;;  %v283_v56 = vsub.f32 %v1399_v45, %v282_v50 }
  0x2e   :  { %1001 = vmatpush3.msra.mxu0 %v1395_v43  ;;  %v174_v57 = vsub.f32 %v869_v49, %v885_v54  ;;  %v289_v58 = vand.u32 4294901760, %v1413_v51  ;;  %vm125_vm1 = vcmp.eq.s32.totalorder %v1333_v13, %v1340_v16  ;;  %v277_v59 = vand.u32 4294901760, %v276_v52 }
  0x2f   :  { %1002 = vmatprep.subr.mxu0 %v1279_v1  ;;  %v884_v60 = vsel %vm125_vm1, 1.0, %v1279_v1  ;;  %v1435_v61 = vsub.f32 %v177_v37, %v1395_v43  ;;  %vm72_vm2 = vcmp.eq.s32.totalorder %v1336_v14, %v1338_v15  ;;  %v284_v62 = vand.u32 4294901760, %v283_v56 }
  0x30   :  { %1003 = vmatpush3.msra.mxu0 %v1404_v46  ;;  %v1440_v63 = vand.u32 4294901760, %v174_v57  ;;  %v290_v0 = vsub.f32 %v1413_v51, %v289_v58  ;;  %v173_v3 = vsub.f32 %v868_v55, %v884_v60  ;;  %1030 = vmatpush3.msra.mxu1 %v277_v59  ;;  %v867_v5 = vsel %vm72_vm2, 1.0, %v1279_v1 }
  0x31   :  { %1004 = vmatprep.subr.mxu0 %v1279_v1  ;;  %v296_v4 = vand.u32 4294901760, %v1435_v61  ;;  %vm124_vm3 = vcmp.eq.s32.totalorder %v1336_v14, %v1340_v16  ;;  %v1451_v6 = vsub.f32 %v176_v40, %v1404_v46  ;;  %1031 = vmatprep.subr.mxu1 %v1279_v1  ;;  %vm71_vm4 = vcmp.eq.s32.totalorder %v1343_v17, %v1338_v15 }
  0x32   :  { %1005 = vmatpush3.msra.mxu0 %v1421_v53  ;;  %v291_v8 = vand.u32 4294901760, %v290_v0  ;;  %v1457_v9 = vand.u32 4294901760, %v173_v3  ;;  %v883_v10 = vsel %vm124_vm3, 1.0, %v1279_v1  ;;  %1032 = vmatpush3.msra.mxu1 %v284_v62  ;;  %v866_v14 = vsel %vm71_vm4, 1.0, %v1279_v1 }
  0x33   :  { %1006 = vmatprep.subr.mxu0 %v1279_v1  ;;  %v297_v11 = vsub.f32 %v1435_v61, %v296_v4  ;;  %v172_v12 = vsub.f32 %v867_v5, %v883_v10  ;;  %v303_v13 = vand.u32 4294901760, %v1451_v6  ;;  %1033 = vmatprep.subr.mxu1 %v1279_v1  ;;  %vm123_vm5 = vcmp.eq.s32.totalorder %v1343_v17, %v1340_v16 }
  0x34   :  { %1007 = vmatpush3.msra.mxu0 %v1440_v63  ;;  %v1473_v23 = vsub.f32 %v175_v48, %v1421_v53  ;;  %vm70_vm6 = vcmp.eq.s32.totalorder %v1346_v18, %v1338_v15  ;;  %v1478_v24 = vand.u32 4294901760, %v1453_v7  ;;  %1034 = vmatpush3.msra.mxu1 %v291_v8  ;;  %v882_v17 = vsel %vm123_vm5, 1.0, %v1279_v1 }
  0x35   :  { %1008 = vmatprep.subr.mxu0 %v1279_v1  ;;  %v298_v25 = vand.u32 4294901760, %v297_v11  ;;  %v1481_v26 = vand.u32 4294901760, %v172_v12  ;;  %v304_v27 = vsub.f32 %v1451_v6, %v303_v13  ;;  %1035 = vmatprep.subr.mxu1 %v1279_v1  ;;  %v171_v28 = vsub.f32 %v866_v14, %v882_v17 }
  0x36   :  { %1009 = vmatpush3.msra.mxu0 %v1457_v9  ;;  %v310_v29 = vand.u32 4294901760, %v1473_v23  ;;  %v865_v30 = vsel %vm70_vm6, 1.0, %v1279_v1  ;;  %vm122_vm7 = vcmp.eq.s32.totalorder %v1346_v18, %v1340_v16  ;;  %v1496_v35 = vsub.f32 %v174_v57, %v1440_v63 }
  0x37   :  { %1036 = vmatpush3.msra.mxu1 %v298_v25  ;;  %1010 = vmatprep.subr.mxu0 %v1279_v1  ;;  %v305_v33 = vand.u32 4294901760, %v304_v27  ;;  %v881_v34 = vsel %vm122_vm7, 1.0, %v1279_v1  ;;  %vm69_vm8 = vcmp.eq.s32.totalorder %v1349_v19, %v1338_v15  ;;  %v1502_v37 = vand.u32 4294901760, %v171_v28 }
  0x38   :  { %1037 = vmatprep.subr.mxu1 %v1279_v1  ;;  %1011 = vmatpush3.msra.mxu0 %v1481_v26  ;;  %v311_v18 = vsub.f32 %v1473_v23, %v310_v29  ;;  %v170_v38 = vsub.f32 %v865_v30, %v881_v34  ;;  %v864_v39 = vsel %vm69_vm8, 1.0, %v1279_v1  ;;  %v317_v40 = vand.u32 4294901760, %v1496_v35 }
  0x39   :  { %1038 = vmatpush3.msra.mxu1 %v305_v33  ;;  %1012 = vmatprep.subr.mxu0 %v1279_v1  ;;  %vm121_vm9 = vcmp.eq.s32.totalorder %v1349_v19, %v1340_v16  ;;  %v1513_v42 = vsub.f32 %v173_v3, %v1457_v9  ;;  %vm68_vm10 = vcmp.eq.s32.totalorder %v1352_v20, %v1338_v15 }
  0x3a   :  { %1039 = vmatprep.subr.mxu1 %v1279_v1  ;;  %1013 = vmatpush3.msra.mxu0 %v1502_v37  ;;  %v312_v44 = vand.u32 4294901760, %v311_v18  ;;  %v1519_v48 = vand.u32 4294901760, %v170_v38  ;;  %v880_v49 = vsel %vm121_vm9, 1.0, %v1279_v1  ;;  %v863_v52 = vsel %vm68_vm10, 1.0, %v1279_v1 }
  0x3b   :  { %1014 = vmatprep.subr.mxu0 %v1279_v1  ;;  %v318_v19 = vsub.f32 %v1496_v35, %v317_v40  ;;  %v169_v54 = vsub.f32 %v864_v39, %v880_v49  ;;  %v324_v55 = vand.u32 4294901760, %v1513_v42  ;;  %vm120_vm11 = vcmp.eq.s32.totalorder %v1352_v20, %v1340_v16 }
  0x3c   :  { %1040 = vmatpush3.msra.mxu1 %v312_v44  ;;  %1015 = vmatpush3.msra.mxu0 %v1519_v48  ;;  %v879_v56 = vsel %vm120_vm11, 1.0, %v1279_v1  ;;  %v1533_v57 = vsub.f32 %v172_v12, %v1481_v26  ;;  %vm67_vm12 = vcmp.eq.s32.totalorder %v1355_v21, %v1338_v15  ;;  %vm119_vm13 = vcmp.eq.s32.totalorder %v1355_v21, %v1340_v16 }
  0x3d   :  { %1041 = vmatprep.subr.mxu1 %v1279_v1  ;;  %v319_v59 = vand.u32 4294901760, %v318_v19  ;;  %1016 = vmatprep.subr.mxu0 %v1279_v1  ;;  %v1541_v20 = vand.u32 4294901760, %v169_v54  ;;  %v325_v60 = vsub.f32 %v1513_v42, %v324_v55  ;;  %v168_v62 = vsub.f32 %v863_v52, %v879_v56 }
  0x3e   :  { %v331_v0 = vand.u32 4294901760, %v1533_v57  ;;  %v862_v3 = vsel %vm67_vm12, 1.0, %v1279_v1  ;;  %v878_v5 = vsel %vm119_vm13, 1.0, %v1279_v1  ;;  %v1550_v21 = vsub.f32 %v171_v28, %v1502_v37 }
  0x3f   :  { %1042 = vmatpush3.msra.mxu1 %v319_v59  ;;  %1017 = vmatpush3.msra.mxu0 %v1541_v20  ;;  %v326_v8 = vand.u32 4294901760, %v325_v60  ;;  %v1553_v10 = vand.u32 4294901760, %v168_v62  ;;  %v167_v11 = vsub.f32 %v862_v3, %v878_v5  ;;  %vm66_vm14 = vcmp.eq.s32.totalorder %v1358_v22, %v1338_v15 }
  0x40   :  { %1043 = vmatprep.subr.mxu1 %v1279_v1  ;;  %1018 = vmatprep.subr.mxu0 %v1279_v1  ;;  %v332_v12 = vsub.f32 %v1533_v57, %v331_v0  ;;  %v338_v14 = vand.u32 4294901760, %v1550_v21  ;;  %v861_v25 = vsel %vm66_vm14, 1.0, %v1279_v1  ;;  %vm118_vm15 = vcmp.eq.s32.totalorder %v1358_v22, %v1340_v16 }
  0x41   :  { %1044 = vmatpush3.msra.mxu1 %v326_v8  ;;  %1019 = vmatpush3.msra.mxu0 %v1553_v10  ;;  %v1567_v27 = vand.u32 4294901760, %v167_v11  ;;  %v877_v17 = vsel %vm118_vm15, 1.0, %v1279_v1  ;;  %v1571_v28 = vsub.f32 %v170_v38, %v1519_v48  ;;  %vm65_vm1 = vcmp.eq.s32.totalorder %v1315_v2, %v1338_v15 }
  0x42   :  { %1045 = vmatprep.subr.mxu1 %v1279_v1  ;;  %v333_v30 = vand.u32 4294901760, %v332_v12  ;;  %1020 = vmatprep.subr.mxu0 %v1279_v1  ;;  %v339_v22 = vsub.f32 %v1550_v21, %v338_v14  ;;  %v166_v33 = vsub.f32 %v861_v25, %v877_v17  ;;  %v860_v34 = vsel %vm65_vm1, 1.0, %v1279_v1 }
  0x43   :  { %1021 = vmatpush3.msra.mxu0 %v1567_v27  ;;  %v345_v18 = vand.u32 4294901760, %v1571_v28  ;;  %vm117_vm2 = vcmp.eq.s32.totalorder %v1315_v2, %v1340_v16  ;;  %v1586_v15 = vsub.f32 %v169_v54, %v1541_v20  ;;  %v1590_v38 = vsub.f32 %v1453_v7, %v1478_v24 }
  0x44   :  { %1046 = vmatpush3.msra.mxu1 %v333_v30  ;;  %v340_v39 = vand.u32 4294901760, %v339_v22  ;;  %1022 = vmatprep.subr.mxu0 %v1279_v1  ;;  %v1593_v44 = vand.u32 4294901760, %v166_v33  ;;  %v876_v49 = vsel %vm117_vm2, 1.0, %v1279_v1  ;;  %v1597_v52 = vsub.f32 %v168_v62, %v1553_v10 }
  0x45   :  { %1047 = vmatprep.subr.mxu1 %v1279_v1  ;;  %v346_v2 = vsub.f32 %v1571_v28, %v345_v18  ;;  %v165_v16 = vsub.f32 %v860_v34, %v876_v49  ;;  %v352_v7 = vand.u32 4294901760, %v1586_v15  ;;  %v264_v19 = vand.u32 4294901760, %v1590_v38 }
  0x46   :  { %1048 = vmatpush3.msra.mxu1 %v340_v39  ;;  %1023 = vmatpush3.msra.mxu0 %v1593_v44  ;;  %v359_v54 = vand.u32 4294901760, %v1597_v52  ;;  %v1608_v56 = vsub.f32 %v167_v11, %v1567_v27  ;;  %v1611_v59 = vsub.f32 %v166_v33, %v1593_v44 }
  0x47   :  { %1049 = vmatprep.subr.mxu1 %v1279_v1  ;;  %v347_v60 = vand.u32 4294901760, %v346_v2  ;;  %1024 = vmatprep.subr.mxu0 %v1279_v1  ;;  %v1615_v62 = vand.u32 4294901760, %v165_v16  ;;  %v353_v3 = vsub.f32 %v1586_v15, %v352_v7  ;;  %v265_v5 = vsub.f32 %v1590_v38, %v264_v19 }
  0x48   :  { %v360_v8 = vsub.f32 %v1597_v52, %v359_v54  ;;  %v366_v11 = vand.u32 4294901760, %v1608_v56  ;;  %v373_v12 = vand.u32 4294901760, %v1611_v59 }
  0x49   :  { %1050 = vmatpush3.msra.mxu1 %v347_v60  ;;  %1025 = vmatpush3.msra.mxu0 %v1615_v62  ;;  %v354_v25 = vand.u32 4294901760, %v353_v3  ;;  %v266_v17 = vand.u32 4294901760, %v265_v5  ;;  %v1630_v30 = vsub.f32 %v165_v16, %v1615_v62 }
  0x4a   :  { %1051 = vmatprep.subr.mxu1 %v1279_v1  ;;  %1064 = vmatprep.subr.mxu0 %v1279_v1  ;;  %v361_v22 = vand.u32 4294901760, %v360_v8  ;;  %v367_v33 = vsub.f32 %v1608_v56, %v366_v11  ;;  %v374_v34 = vsub.f32 %v1611_v59, %v373_v12 }
  0x4b   :  { %1052 = vmatpush3.msra.mxu1 %v354_v25  ;;  %1027 = vmatmul.mubr.f32.vlgmr.msra.gmra.mxu0 %v266_v17  ;;  %v380_v39 = vand.u32 4294901760, %v1630_v30 }
  0x4c   :  { %1053 = vmatprep.subr.mxu1 %v1279_v1  ;;  %1065 = vmatpush3.msra.mxu0 %v1390_v41  ;;  %v368_v49 = vand.u32 4294901760, %v367_v33  ;;  %v375_v2 = vand.u32 4294901760, %v374_v34 }
  0x4d   :  { %1054 = vmatpush3.msra.mxu1 %v361_v22  ;;  %1066 = vmatprep.subr.mxu0 %v1279_v1  ;;  %v381_v16 = vsub.f32 %v1630_v30, %v380_v39 }
  0x4e   :  { %1055 = vmatprep.subr.mxu1 %v1279_v1  ;;  %1067 = vmatpush3.msra.mxu0 %v1399_v45 }
  0x4f   :  { %1056 = vmatpush3.msra.mxu1 %v368_v49  ;;  %1068 = vmatprep.subr.mxu0 %v1279_v1  ;;  %v382_v60 = vand.u32 4294901760, %v381_v16 }
  0x50   :  { %1057 = vmatprep.subr.mxu1 %v1279_v1  ;;  %1069 = vmatpush3.msra.mxu0 %v1413_v51 }
  0x51   :  { %1058 = vmatpush3.msra.mxu1 %v375_v2  ;;  %1070 = vmatprep.subr.mxu0 %v1279_v1 }
  0x52   :  { %1059 = vmatprep.subr.mxu1 %v1279_v1  ;;  %1071 = vmatpush3.msra.mxu0 %v1435_v61 }
  0x53   :  { %1060 = vmatpush3.msra.mxu1 %v382_v60  ;;  %1072 = vmatprep.subr.mxu0 %v1279_v1 }
  0x54   :  { %1062 = vmatmul.mubr.f32.vlgmr.msra.gmra.mxu1 %v1478_v24  ;;  %1099 = vmatprep.subr.mxu1 %v1279_v1 }
  0x55   :  { %1073 = vmatpush3.msra.mxu0 %v1451_v6  ;;  %1100 = vmatpush3.msra.mxu1 %v1374_v31 }
  0x56   :  { %1074 = vmatprep.subr.mxu0 %v1279_v1  ;;  %1101 = vmatprep.subr.mxu1 %v1279_v1 }
  0x57   :  { %1075 = vmatpush3.msra.mxu0 %v1473_v23  ;;  %1102 = vmatpush3.msra.mxu1 %v1376_v32 }
  0x58   :  { %1076 = vmatprep.subr.mxu0 %v1279_v1  ;;  %1103 = vmatprep.subr.mxu1 %v1279_v1 }
  0x59   :  { %1077 = vmatpush3.msra.mxu0 %v1496_v35  ;;  %1104 = vmatpush3.msra.mxu1 %v1384_v36 }
  0x5a   :  { %1078 = vmatprep.subr.mxu0 %v1279_v1  ;;  %1105 = vmatprep.subr.mxu1 %v1279_v1 }
  0x5b   :  { %1079 = vmatpush3.msra.mxu0 %v1513_v42  ;;  %1106 = vmatpush3.msra.mxu1 %v1395_v43  ;;  %v839_v42 = vld [vmem:[%s1816_s2] sm:$0x1] }
  0x5c   :  { %1080 = vmatprep.subr.mxu0 %v1279_v1  ;;  %1107 = vmatprep.subr.mxu1 %v1279_v1 }
  0x5d   :  { %1081 = vmatpush3.msra.mxu0 %v1533_v57  ;;  %1108 = vmatpush3.msra.mxu1 %v1404_v46 }
  0x5e   :  { %1082 = vmatprep.subr.mxu0 %v1279_v1  ;;  %1109 = vmatprep.subr.mxu1 %v1279_v1 }
  0x5f   :  { %1083 = vmatpush3.msra.mxu0 %v1550_v21  ;;  %1110 = vmatpush3.msra.mxu1 %v1421_v53 }
  0x60   :  { %1084 = vmatprep.subr.mxu0 %v1279_v1  ;;  %1111 = vmatprep.subr.mxu1 %v1279_v1 }
  0x61   :  { %1085 = vmatpush3.msra.mxu0 %v1571_v28  ;;  %1112 = vmatpush3.msra.mxu1 %v1440_v63 }
  0x62   :  { %1086 = vmatprep.subr.mxu0 %v1279_v1  ;;  %1113 = vmatprep.subr.mxu1 %v1279_v1 }
  0x63   :  { %1087 = vmatpush3.msra.mxu0 %v1586_v15  ;;  %1114 = vmatpush3.msra.mxu1 %v1457_v9 }
  0x64   :  { %1088 = vmatprep.subr.mxu0 %v1279_v1  ;;  %1115 = vmatprep.subr.mxu1 %v1279_v1 }
  0x65   :  { %1089 = vmatpush3.msra.mxu0 %v1597_v52  ;;  %1116 = vmatpush3.msra.mxu1 %v1481_v26 }
  0x66   :  { %1090 = vmatprep.subr.mxu0 %v1279_v1  ;;  %1117 = vmatprep.subr.mxu1 %v1279_v1 }
  0x67   :  { %1091 = vmatpush3.msra.mxu0 %v1608_v56  ;;  %1118 = vmatpush3.msra.mxu1 %v1502_v37 }
  0x68   :  { %1092 = vmatprep.subr.mxu0 %v1279_v1  ;;  %1119 = vmatprep.subr.mxu1 %v1279_v1 }
  0x69   :  { %1093 = vmatpush3.msra.mxu0 %v1611_v59  ;;  %1120 = vmatpush3.msra.mxu1 %v1519_v48 }
  0x6a   :  { %1094 = vmatprep.subr.mxu0 %v1279_v1  ;;  %1121 = vmatprep.subr.mxu1 %v1279_v1 }
  0x6b   :  { %1095 = vmatpush3.msra.mxu0 %v1630_v30  ;;  %1096 = vmatprep.mubr.msk.f32.mxu0 %vm1280_vm0, %v1279_v1 }
  0x6c   :  { %1122 = vmatpush3.msra.mxu1 %v1541_v20  ;;  %1097 = vmatmul.mubr.f32.vlgmr.msra.gmra.mxu0 %v1590_v38 }
  0x6d   :  { %1123 = vmatprep.subr.mxu1 %v1279_v1  ;;  %1134 = vmatprep.subr.mxu0 %v1279_v1 }
  0x6e   :  { %1124 = vmatpush3.msra.mxu1 %v1553_v10  ;;  %1135 = vmatpush3.msra.mxu0 %v275_v47 }
  0x6f   :  { %1125 = vmatprep.subr.mxu1 %v1279_v1  ;;  %1136 = vmatprep.subr.mxu0 %v1279_v1 }
  0x70   :  { %1126 = vmatpush3.msra.mxu1 %v1567_v27  ;;  %1137 = vmatpush3.msra.mxu0 %v282_v50 }
  0x71   :  { %1127 = vmatprep.subr.mxu1 %v1279_v1  ;;  %1138 = vmatprep.subr.mxu0 %v1279_v1 }
  0x72   :  { %1128 = vmatpush3.msra.mxu1 %v1593_v44  ;;  %1139 = vmatpush3.msra.mxu0 %v289_v58 }
  0x73   :  { %1129 = vmatprep.subr.mxu1 %v1279_v1  ;;  %1140 = vmatprep.subr.mxu0 %v1279_v1 }
  0x74   :  { %1130 = vmatpush3.msra.mxu1 %v1615_v62  ;;  %1131 = vmatprep.mubr.msk.f32.mxu1 %vm1280_vm0, %v1279_v1 }
  0x75   :  { %1141 = vmatpush3.msra.mxu0 %v296_v4  ;;  %1132 = vmatmul.mubr.f32.vlgmr.msra.gmra.mxu1 %v264_v19 }
  0x76   :  { %1142 = vmatprep.subr.mxu0 %v1279_v1  ;;  %1169 = vmatprep.subr.mxu1 %v1279_v1 }
  0x77   :  { %1143 = vmatpush3.msra.mxu0 %v303_v13  ;;  %1170 = vmatpush3.msra.mxu1 %v1374_v31 }
  0x78   :  { %1144 = vmatprep.subr.mxu0 %v1279_v1  ;;  %1171 = vmatprep.subr.mxu1 %v1279_v1 }
  0x79   :  { %1145 = vmatpush3.msra.mxu0 %v310_v29  ;;  %1172 = vmatpush3.msra.mxu1 %v1376_v32 }
  0x7a   :  { %1146 = vmatprep.subr.mxu0 %v1279_v1  ;;  %1173 = vmatprep.subr.mxu1 %v1279_v1 }
  0x7b   :  { %1147 = vmatpush3.msra.mxu0 %v317_v40  ;;  %1174 = vmatpush3.msra.mxu1 %v1384_v36  ;;  %v837_v40 = vld [vmem:[%s1817_s3] sm:$0x1] }
  0x7c   :  { %1148 = vmatprep.subr.mxu0 %v1279_v1  ;;  %1175 = vmatprep.subr.mxu1 %v1279_v1  ;;  %v838_v57 = vmul.f32 0.5, %v837_v40 }
  0x7d   :  { %1149 = vmatpush3.msra.mxu0 %v324_v55  ;;  %1176 = vmatpush3.msra.mxu1 %v1395_v43 }
  0x7e   :  { %1150 = vmatprep.subr.mxu0 %v1279_v1  ;;  %1177 = vmatprep.subr.mxu1 %v1279_v1 }
  0x7f   :  { %1151 = vmatpush3.msra.mxu0 %v331_v0  ;;  %1178 = vmatpush3.msra.mxu1 %v1404_v46 }
  0x80   :  { %1152 = vmatprep.subr.mxu0 %v1279_v1  ;;  %1179 = vmatprep.subr.mxu1 %v1279_v1 }
  0x81   :  { %1153 = vmatpush3.msra.mxu0 %v338_v14  ;;  %1180 = vmatpush3.msra.mxu1 %v1421_v53 }
  0x82   :  { %1154 = vmatprep.subr.mxu0 %v1279_v1  ;;  %1181 = vmatprep.subr.mxu1 %v1279_v1 }
  0x83   :  { %1155 = vmatpush3.msra.mxu0 %v345_v18  ;;  %1182 = vmatpush3.msra.mxu1 %v1440_v63 }
  0x84   :  { %1156 = vmatprep.subr.mxu0 %v1279_v1  ;;  %1183 = vmatprep.subr.mxu1 %v1279_v1 }
  0x85   :  { %1157 = vmatpush3.msra.mxu0 %v352_v7  ;;  %1184 = vmatpush3.msra.mxu1 %v1457_v9 }
  0x86   :  { %1158 = vmatprep.subr.mxu0 %v1279_v1  ;;  %1185 = vmatprep.subr.mxu1 %v1279_v1 }
  0x87   :  { %1159 = vmatpush3.msra.mxu0 %v359_v54  ;;  %1186 = vmatpush3.msra.mxu1 %v1481_v26 }
  0x88   :  { %1160 = vmatprep.subr.mxu0 %v1279_v1  ;;  %1187 = vmatprep.subr.mxu1 %v1279_v1 }
  0x89   :  { %1161 = vmatpush3.msra.mxu0 %v366_v11  ;;  %1188 = vmatpush3.msra.mxu1 %v1502_v37 }
  0x8a   :  { %1162 = vmatprep.subr.mxu0 %v1279_v1  ;;  %1189 = vmatprep.subr.mxu1 %v1279_v1 }
  0x8b   :  { %1163 = vmatpush3.msra.mxu0 %v373_v12  ;;  %1190 = vmatpush3.msra.mxu1 %v1519_v48 }
  0x8c   :  { %1164 = vmatprep.subr.mxu0 %v1279_v1  ;;  %1191 = vmatprep.subr.mxu1 %v1279_v1 }
  0x8d   :  { %1165 = vmatpush3.msra.mxu0 %v380_v39  ;;  %1166 = vmatprep.mubr.msk.f32.mxu0 %vm1280_vm0, %v1279_v1 }
  0x8e   :  { %1192 = vmatpush3.msra.mxu1 %v1541_v20  ;;  %1167 = vmatmul.mubr.f32.vlgmr.msra.gmra.mxu0 %v1478_v24 }
  0x8f   :  { %1193 = vmatprep.subr.mxu1 %v1279_v1  ;;  %1201 = vmatprep.mubr.msk.f32.mxu1 %vm1280_vm0, %v1279_v1 }
  0x90   :  { %1194 = vmatpush3.msra.mxu1 %v1553_v10 }
  0x91   :  { %1195 = vmatprep.subr.mxu1 %v1279_v1 }
  0x92   :  { %1196 = vmatpush3.msra.mxu1 %v1567_v27 }
  0x93   :  { %1197 = vmatprep.subr.mxu1 %v1279_v1 }
  0x94   :  { %1198 = vmatpush3.msra.mxu1 %v1593_v44 }
  0x95   :  { %1199 = vmatprep.subr.mxu1 %v1279_v1 }
  0x96   :  { %1200 = vmatpush3.msra.mxu1 %v1615_v62 }
  0x97   :  { %1202 = vmatmul.mubr.f32.vlgmr.msra.gmra.mxu1 %v1478_v24 }
 0x10b   :  { %v268_v31 = vpop.f32.mrf.mxu0 }
 0x10d   :  { %v1028_v32 = vpop.f32.mrf.mxu0 }
 0x114   :  { %v419_v36 = vpop.f32.mrf.mxu1 }
 0x115   :  { %v420_v51 = vadd.f32 %v419_v36, %v268_v31 }
 0x116   :  { %v1063_v41 = vpop.f32.mrf.mxu1 }
 0x12c   :  { %v523_v43 = vpop.f32.mrf.mxu0 }
 0x12d   :  { %v524_v58 = vadd.f32 %v523_v43, %v420_v51 }
 0x12e   :  { %v1098_v45 = vpop.f32.mrf.mxu0 }
 0x135   :  { %v612_v46 = vpop.f32.mrf.mxu1 }
 0x136   :  { %v613_v61 = vadd.f32 %v612_v46, %v524_v58 }
 0x137   :  { %v1133_v47 = vpop.f32.mrf.mxu1 }
 0x14e   :  { %v731_v50 = vpop.f32.mrf.mxu0 }
 0x14f   :  { %v732_v63 = vadd.f32 %v731_v50, %v613_v61 }
 0x150   :  { %v1168_v53 = vpop.f32.mrf.mxu0 }
 0x157   :  { %v818_v4 = vpop.f32.mrf.mxu1 }
 0x158   :  { %v819_v1 = vadd.f32 %v818_v4, %v732_v63 }
 0x159   :  { %v1203_v6 = vpop.f32.mrf.mxu1 }
 0x15a   :  { %v822_v9 = vmul.f32 %v819_v1, %v819_v1 }
 0x15c   :  { %v824_v13 = vrot.slane %v822_v9, 1  ;;  %v827_v24 = vrot.slane %v822_v9, 2 }
 0x15e   :  { %v826_v23 = vadd.f32 %v824_v13, %v822_v9 }
 0x160   :  { %v829_v26 = vadd.f32 %v827_v24, %v826_v23 }
 0x162   :  { %1209 = vrsqrt.f32 %v829_v26  ;;  %vm832_vm0 = vcmp.eq.f32.partialorder %v829_v26, inf  ;;  %v835_v37 = vand.u32 2147483648, %v829_v26  ;;  %vm834_vm3 = vcmp.eq.f32.partialorder %v829_v26, 0.0 }
 0x16f   :  { %v1210_v29 = vpop.eup %1209 }
 0x170   :  { %v831_v35 = vmul.f32 %v1210_v29, %v829_v26 }
 0x172   :  { %v833_v48 = vsel %vm832_vm0, %v829_v26, %v831_v35 }
 0x173   :  { %v836_v55 = vsel %vm834_vm3, %v835_v37, %v833_v48 }
 0x174   :  { %v840_v20 = vsub.f32 %v836_v55, %v839_v42 }
 0x176   :  { %v841_v0 = vmul.f32 %v840_v20, %v840_v20 }
 0x178   :  { %v842_v21 = vmul.f32 %v841_v0, %v838_v57 }
 0x17a   :  { %843 = vst [vmem:[#allocation7] sm:$0x1] %v842_v21 }
 0x17b   :  { %1262 = shalt.err (!%p1259_p0)
}
 0x17c   :  { %853 = dma.vmem_to_hbm [thread:$0]  %s851_s28, 16, %s1818_s4, [#allocation4]  }
 0x17d   :  { %1275 = dma.done.wait [#allocation4], 16  }
 0x17e   :  { %1276 = vsyncadd [#allocation4], 4294967280 }
 0x17f   :  { %857 = vsyncpa [#allocation3], 1 }
 0x180   :  { %858 = vsyncpa [#allocation6], 1 }
 0x181   :  { %859 = vsyncpa [#allocation4], 1 }

</bundles_post_ra>
